<compile_context>
chip_gen: v5e
topology: v5e:2x2
jax: 0.10.0
libtpu: 0.0.40
codegen_flags: <defaults>
</compile_context>

<pallas_src>
import jax
import jax.numpy as jnp
from jax.experimental import pallas as pl
from jax.experimental.pallas import tpu as pltpu


def _largest_divisor_leq(n, cap):
    """Largest divisor of n that is <= cap (>= 1)."""
    cap = max(1, min(n, cap))
    for d in range(cap, 0, -1):
        if n % d == 0:
            return d
    return 1


def unbind_dim1(x, *, target_in_block_bytes=1 << 20, max_resident_out_bytes=2 << 20):
    """Pallas equivalent of torch.unbind(x, 1): tuple of C arrays of shape (B, H, W)."""
    B, C, H, W = x.shape
    itemsize = jnp.dtype(x.dtype).itemsize
    plane_bytes = H * W * itemsize  # one (H, W) plane

    # Batch rows per grid step: all C output blocks (tb, H, W) stay VMEM-resident
    # across the inner channel-group loop, so bound tb by C * plane_bytes.
    # Conservative cap keeps us well under v7x's 64 MiB per-TC VMEM.
    tb = _largest_divisor_leq(B, max(1, max_resident_out_bytes // max(C * plane_bytes, 1)))
    # Channels per grid step: size the streamed input block to ~target bytes
    # (0.5-2 MiB is the sweet spot); whole-C for the small test shape.
    tc = _largest_divisor_leq(C, max(1, target_in_block_bytes // max(tb * plane_bytes, 1)))

    n_b = B // tb   # outer grid axis ("parallel": disjoint output blocks per b)
    n_g = C // tc   # inner grid axis ("arbitrary": outputs resident across it)

    def kernel(x_ref, *out_refs):
        # x_ref:    (tb, tc, H, W)  — channel-group slab of the input.
        # out_refs: C refs of shape (tb, H, W) — the unbind outputs' batch slabs.
        # Each output ref keeps a constant block index over the channel-group
        # axis, so it stays VMEM-resident and is written back once per batch
        # slab; the pl.when gate picks the grid step that owns channel c.
        g = pl.program_id(1)
        for c in range(C):
            @pl.when(g == c // tc)
            def _(c=c):
                out_refs[c][...] = x_ref[:, c % tc, :, :]

    out = pl.pallas_call(
        kernel,
        out_shape=tuple(jax.ShapeDtypeStruct((B, H, W), x.dtype) for _ in range(C)),
        grid=(n_b, n_g),  # batch slabs outer, channel groups inner (fastest)
        in_specs=[
            pl.BlockSpec((tb, tc, H, W), lambda b, g: (b, g, 0, 0)),
        ],
        out_specs=tuple(
            pl.BlockSpec((tb, H, W), lambda b, g: (b, 0, 0)) for _ in range(C)
        ),
        compiler_params=pltpu.CompilerParams(
            dimension_semantics=("parallel", "arbitrary"),
        ),
        cost_estimate=pl.CostEstimate(
            flops=0,
            transcendentals=0,
            bytes_accessed=2 * x.size * itemsize,  # read once + write once
        ),
    )(x)
    return out


if __name__ == "__main__":
    key = jax.random.PRNGKey(0)
    B, C, H, W = 2, 4, 16, 16
    x = jax.random.normal(key, (B, C, H, W), dtype=jnp.float32)

    outs = unbind_dim1(x)
    outs = jax.block_until_ready(outs)

    # Reference: plain JAX unbind along axis 1.
    refs = tuple(x[:, c, :, :] for c in range(C))

    assert len(outs) == C
    for o, r in zip(outs, refs):
        assert o.shape == (B, H, W)
        assert o.dtype == x.dtype
        assert jnp.array_equal(o, r)

    print("KERNEL_OK")
</pallas_src>

<mosaic_0001>
module attributes {stable_mosaic.version = 11 : i64} {
  func.func @kernel(%arg0: i32, %arg1: i32, %arg2: memref<2x4x16x16xf32, #tpu.memory_space<vmem>>, %arg3: memref<2x16x16xf32, #tpu.memory_space<vmem>>, %arg4: memref<2x16x16xf32, #tpu.memory_space<vmem>>, %arg5: memref<2x16x16xf32, #tpu.memory_space<vmem>>, %arg6: memref<2x16x16xf32, #tpu.memory_space<vmem>>) attributes {dimension_semantics = [#tpu.dimension_semantics<parallel>, #tpu.dimension_semantics<arbitrary>], iteration_bounds = array<i64: 1, 1>, scalar_prefetch = 0 : i64, scratch_operands = 0 : i64, tpu.core_type = #tpu.core_type<tc>, window_params = [{transform_indices = @transform_0, window_bounds = array<i64: 2, 4, 16, 16>}, {transform_indices = @transform_1, window_bounds = array<i64: 2, 16, 16>}, {transform_indices = @transform_2, window_bounds = array<i64: 2, 16, 16>}, {transform_indices = @transform_3, window_bounds = array<i64: 2, 16, 16>}, {transform_indices = @transform_4, window_bounds = array<i64: 2, 16, 16>}]} {
    %c0_i32 = arith.constant 0 : i32
    %0 = arith.cmpi eq, %arg1, %c0_i32 : i32
    %1 = arith.extui %0 : i1 to i32
    %c0_i32_0 = arith.constant 0 : i32
    %2 = arith.cmpi ne, %1, %c0_i32_0 : i32
    scf.if %2 {
      %c0 = arith.constant 0 : index
      %c0_7 = arith.constant 0 : index
      %c0_8 = arith.constant 0 : index
      %c0_9 = arith.constant 0 : index
      %12 = vector.load %arg2[%c0, %c0_7, %c0_8, %c0_9] : memref<2x4x16x16xf32, #tpu.memory_space<vmem>>, vector<2x1x16x16xf32>
      %13 = vector.shape_cast %12 : vector<2x1x16x16xf32> to vector<2x16x16xf32>
      %c0_10 = arith.constant 0 : index
      %c0_11 = arith.constant 0 : index
      %c0_12 = arith.constant 0 : index
      %14 = vector.load %arg3[%c0_10, %c0_11, %c0_12] : memref<2x16x16xf32, #tpu.memory_space<vmem>>, vector<2x16x16xf32>
      tpu.vector_store %arg3[%c0_10, %c0_11, %c0_12], %13 {strides = array<i32>} : memref<2x16x16xf32, #tpu.memory_space<vmem>>, vector<2x16x16xf32>,
    } else {
    }
    %c0_i32_1 = arith.constant 0 : i32
    %3 = arith.cmpi eq, %arg1, %c0_i32_1 : i32
    %4 = arith.extui %3 : i1 to i32
    %c0_i32_2 = arith.constant 0 : i32
    %5 = arith.cmpi ne, %4, %c0_i32_2 : i32
    scf.if %5 {
      %c0 = arith.constant 0 : index
      %c1 = arith.constant 1 : index
      %c0_7 = arith.constant 0 : index
      %c0_8 = arith.constant 0 : index
      %12 = vector.load %arg2[%c0, %c1, %c0_7, %c0_8] : memref<2x4x16x16xf32, #tpu.memory_space<vmem>>, vector<2x1x16x16xf32>
      %13 = vector.shape_cast %12 : vector<2x1x16x16xf32> to vector<2x16x16xf32>
      %c0_9 = arith.constant 0 : index
      %c0_10 = arith.constant 0 : index
      %c0_11 = arith.constant 0 : index
      %14 = vector.load %arg4[%c0_9, %c0_10, %c0_11] : memref<2x16x16xf32, #tpu.memory_space<vmem>>, vector<2x16x16xf32>
      tpu.vector_store %arg4[%c0_9, %c0_10, %c0_11], %13 {strides = array<i32>} : memref<2x16x16xf32, #tpu.memory_space<vmem>>, vector<2x16x16xf32>,
    } else {
    }
    %c0_i32_3 = arith.constant 0 : i32
    %6 = arith.cmpi eq, %arg1, %c0_i32_3 : i32
    %7 = arith.extui %6 : i1 to i32
    %c0_i32_4 = arith.constant 0 : i32
    %8 = arith.cmpi ne, %7, %c0_i32_4 : i32
    scf.if %8 {
      %c0 = arith.constant 0 : index
      %c2 = arith.constant 2 : index
      %c0_7 = arith.constant 0 : index
      %c0_8 = arith.constant 0 : index
      %12 = vector.load %arg2[%c0, %c2, %c0_7, %c0_8] : memref<2x4x16x16xf32, #tpu.memory_space<vmem>>, vector<2x1x16x16xf32>
      %13 = vector.shape_cast %12 : vector<2x1x16x16xf32> to vector<2x16x16xf32>
      %c0_9 = arith.constant 0 : index
      %c0_10 = arith.constant 0 : index
      %c0_11 = arith.constant 0 : index
      %14 = vector.load %arg5[%c0_9, %c0_10, %c0_11] : memref<2x16x16xf32, #tpu.memory_space<vmem>>, vector<2x16x16xf32>
      tpu.vector_store %arg5[%c0_9, %c0_10, %c0_11], %13 {strides = array<i32>} : memref<2x16x16xf32, #tpu.memory_space<vmem>>, vector<2x16x16xf32>,
    } else {
    }
    %c0_i32_5 = arith.constant 0 : i32
    %9 = arith.cmpi eq, %arg1, %c0_i32_5 : i32
    %10 = arith.extui %9 : i1 to i32
    %c0_i32_6 = arith.constant 0 : i32
    %11 = arith.cmpi ne, %10, %c0_i32_6 : i32
    scf.if %11 {
      %c0 = arith.constant 0 : index
      %c3 = arith.constant 3 : index
      %c0_7 = arith.constant 0 : index
      %c0_8 = arith.constant 0 : index
      %12 = vector.load %arg2[%c0, %c3, %c0_7, %c0_8] : memref<2x4x16x16xf32, #tpu.memory_space<vmem>>, vector<2x1x16x16xf32>
      %13 = vector.shape_cast %12 : vector<2x1x16x16xf32> to vector<2x16x16xf32>
      %c0_9 = arith.constant 0 : index
      %c0_10 = arith.constant 0 : index
      %c0_11 = arith.constant 0 : index
      %14 = vector.load %arg6[%c0_9, %c0_10, %c0_11] : memref<2x16x16xf32, #tpu.memory_space<vmem>>, vector<2x16x16xf32>
      tpu.vector_store %arg6[%c0_9, %c0_10, %c0_11], %13 {strides = array<i32>} : memref<2x16x16xf32, #tpu.memory_space<vmem>>, vector<2x16x16xf32>,
    } else {
    }
    return
  }
  func.func @transform_0(%arg0: i32, %arg1: i32) -> (i32, i32, i32, i32) {
    %c0_i32 = arith.constant 0 : i32
    %c0_i32_0 = arith.constant 0 : i32
    %c0_i32_1 = arith.constant 0 : i32
    return %arg0, %arg1, %c0_i32, %c0_i32_0 : i32, i32, i32, i32
  }
  func.func @transform_1(%arg0: i32, %arg1: i32) -> (i32, i32, i32) {
    %c0_i32 = arith.constant 0 : i32
    %c0_i32_0 = arith.constant 0 : i32
    %c0_i32_1 = arith.constant 0 : i32
    return %arg0, %c0_i32, %c0_i32_0 : i32, i32, i32
  }
  func.func @transform_2(%arg0: i32, %arg1: i32) -> (i32, i32, i32) {
    %c0_i32 = arith.constant 0 : i32
    %c0_i32_0 = arith.constant 0 : i32
    %c0_i32_1 = arith.constant 0 : i32
    return %arg0, %c0_i32, %c0_i32_0 : i32, i32, i32
  }
  func.func @transform_3(%arg0: i32, %arg1: i32) -> (i32, i32, i32) {
    %c0_i32 = arith.constant 0 : i32
    %c0_i32_0 = arith.constant 0 : i32
    %c0_i32_1 = arith.constant 0 : i32
    return %arg0, %c0_i32, %c0_i32_0 : i32, i32, i32
  }
  func.func @transform_4(%arg0: i32, %arg1: i32) -> (i32, i32, i32) {
    %c0_i32 = arith.constant 0 : i32
    %c0_i32_0 = arith.constant 0 : i32
    %c0_i32_1 = arith.constant 0 : i32
    return %arg0, %c0_i32, %c0_i32_0 : i32, i32, i32
  }
}

</mosaic_0001>

<bundles_post_ra>
// kernel: tpu_custom_call.1
= control target key start
LH: loop header
LB: loop body
LE: loop exit
PB: predicated region body
PF: predicated region fallthrough
CT: control target
= control target key end

     0   :  { %10 = vsyncpa [#allocation3], 0  ;;  %s356_s0 = inlined_call_operand.hbm [shape: f32[2,4,16,16], index: 0, kind: input, shape index: {}]   ;;  %s357_s1 = inlined_call_operand.hbm [shape: f32[2,16,16], index: 1, kind: output, shape index: {0}]   ;;  %s358_s2 = inlined_call_operand.hbm [shape: f32[2,16,16], index: 2, kind: output, shape index: {1}]   ;;  %s359_s3 = inlined_call_operand.hbm [shape: f32[2,16,16], index: 3, kind: output, shape index: {2}]   ;;  %s360_s4 = inlined_call_operand.hbm [shape: f32[2,16,16], index: 4, kind: output, shape index: {3}]  }
   0x1   :  { %11 = vsyncpa [#allocation4], 0 }
   0x2   :  { %12 = vsyncpa [#allocation7], 0 }
   0x3   :  { %13 = vsyncpa [#allocation10], 0  ;;  %s18_s17 = sshll.u32 %s356_s0, 4  ;;  %s278_s18 = smov [#allocation2]   ;;  %s19_s17 = int_to_ptr.hbm [resolvable:$true] %s18_s17 }
   0x4   :  { %s20_s19 = sshll.u32 %s278_s18, 4  ;;  %s279_s20 = smov 128   ;;  %s21_s19 = int_to_ptr.vmem [resolvable:$true] %s20_s19 }
   0x5   :  { %s280_s21 = smov 8  }
   0x6   :  { %26 = dma.hbm_to_vmem [thread:$0]  %s19_s17, 2048, %s21_s19, [#allocation3], %s279_s20, %s279_s20, %s280_s21  }
   0x7   :  { %270 = dma.done.wait [#allocation3], 2048  }
   0x8   :  { %271 = vsyncadd [#allocation3], 4294965248  ;;  %vm39_vm0 = vcmask 130048   ;;  %s281_s22 = smov [#allocation6]   ;;  %s90_s26 = sshll.u32 %s358_s2, 4  ;;  %v45_v0 = vld [vmem:[#allocation2 + $0x10] sm:$0xff]  ;;  %s91_s26 = int_to_ptr.hbm [resolvable:$true] %s90_s26 }
   0x9   :  { %s88_s23 = sshll.u32 %s281_s22, 4  ;;  %v46_v1 = vld [vmem:[#allocation2 + $0x18] sm:$0xff]  ;;  %v47_v2 = vld [vmem:[#allocation2 + $0x50] sm:$0xff]  ;;  %49 = vst.msk [vmem:[#allocation6] sm:$0xff] %vm39_vm0, %v45_v0  ;;  %v35_v4 = vld [vmem:[#allocation2] sm:$0xff]  ;;  %s282_s0 = smov [#allocation5]   ;;  %s89_s23 = int_to_ptr.vmem [resolvable:$true] %s88_s23 }
   0xa   :  { %v48_v3 = vld [vmem:[#allocation2 + $0x58] sm:$0xff]  ;;  %50 = vst.msk [vmem:[#allocation6 + $0x8] sm:$0xff] %vm39_vm0, %v46_v1  ;;  %v36_v5 = vld [vmem:[#allocation2 + $0x8] sm:$0xff]  ;;  %s75_s27 = sshll.u32 %s282_s0, 4  ;;  %s77_s2 = sshll.u32 %s357_s1, 4  ;;  %v37_v6 = vld [vmem:[#allocation2 + $0x40] sm:$0xff]  ;;  %s76_s27 = int_to_ptr.vmem [resolvable:$true] %s75_s27  ;;  %s78_s2 = int_to_ptr.hbm [resolvable:$true] %s77_s2 }
   0xb   :  { %51 = vst.msk [vmem:[#allocation6 + $0x10] sm:$0xff] %vm39_vm0, %v47_v2  ;;  %v38_v7 = vld [vmem:[#allocation2 + $0x48] sm:$0xff]  ;;  %v54_v8 = vld [vmem:[#allocation2 + $0x20] sm:$0xff]  ;;  %s283_s30 = smov [#allocation8]   ;;  %s103_s7 = sshll.u32 %s359_s3, 4  ;;  %v63_v12 = vld [vmem:[#allocation2 + $0x30] sm:$0xff]  ;;  %s104_s7 = int_to_ptr.hbm [resolvable:$true] %s103_s7 }
   0xc   :  { %52 = vst.msk [vmem:[#allocation6 + $0x18] sm:$0xff] %vm39_vm0, %v48_v3  ;;  %v55_v9 = vld [vmem:[#allocation2 + $0x28] sm:$0xff]  ;;  %s101_s1 = sshll.u32 %s283_s30, 4  ;;  %v56_v10 = vld [vmem:[#allocation2 + $0x60] sm:$0xff]  ;;  %v64_v13 = vld [vmem:[#allocation2 + $0x38] sm:$0xff]  ;;  %s284_s8 = smov [#allocation9]   ;;  %s102_s1 = int_to_ptr.vmem [resolvable:$true] %s101_s1 }
   0xd   :  { %40 = vst.msk [vmem:[#allocation5] sm:$0xff] %vm39_vm0, %v35_v4  ;;  %96 = dma.vmem_to_hbm [thread:$0]  %s89_s23, 512, %s91_s26, [#allocation7], %s279_s20, %s279_s20, %s280_s21   ;;  %v57_v11 = vld [vmem:[#allocation2 + $0x68] sm:$0xff]  ;;  %v65_v14 = vld [vmem:[#allocation2 + $0x70] sm:$0xff]  ;;  %v66_v15 = vld [vmem:[#allocation2 + $0x78] sm:$0xff] }
   0xe   :  { %41 = vst.msk [vmem:[#allocation5 + $0x8] sm:$0xff] %vm39_vm0, %v36_v5  ;;  %s114_s3 = sshll.u32 %s284_s8, 4  ;;  %s116_s11 = sshll.u32 %s360_s4, 4  ;;  %s115_s3 = int_to_ptr.vmem [resolvable:$true] %s114_s3  ;;  %s117_s11 = int_to_ptr.hbm [resolvable:$true] %s116_s11 }
   0xf   :  { %42 = vst.msk [vmem:[#allocation5 + $0x10] sm:$0xff] %vm39_vm0, %v37_v6 }
  0x10   :  { %43 = vst.msk [vmem:[#allocation5 + $0x18] sm:$0xff] %vm39_vm0, %v38_v7 }
  0x11   :  { %58 = vst.msk [vmem:[#allocation8] sm:$0xff] %vm39_vm0, %v54_v8  ;;  %83 = dma.vmem_to_hbm [thread:$0]  %s76_s27, 512, %s78_s2, [#allocation4], %s279_s20, %s279_s20, %s280_s21  }
  0x12   :  { %59 = vst.msk [vmem:[#allocation8 + $0x8] sm:$0xff] %vm39_vm0, %v55_v9 }
  0x13   :  { %60 = vst.msk [vmem:[#allocation8 + $0x10] sm:$0xff] %vm39_vm0, %v56_v10 }
  0x14   :  { %61 = vst.msk [vmem:[#allocation8 + $0x18] sm:$0xff] %vm39_vm0, %v57_v11 }
  0x15   :  { %67 = vst.msk [vmem:[#allocation9] sm:$0xff] %vm39_vm0, %v63_v12  ;;  %109 = dma.vmem_to_hbm [thread:$0]  %s102_s1, 512, %s104_s7, [#allocation7], %s279_s20, %s279_s20, %s280_s21  }
  0x16   :  { %68 = vst.msk [vmem:[#allocation9 + $0x8] sm:$0xff] %vm39_vm0, %v64_v13 }
  0x17   :  { %69 = vst.msk [vmem:[#allocation9 + $0x10] sm:$0xff] %vm39_vm0, %v65_v14 }
  0x18   :  { %70 = vst.msk [vmem:[#allocation9 + $0x18] sm:$0xff] %vm39_vm0, %v66_v15 }
  0x19   :  { %122 = dma.vmem_to_hbm [thread:$0]  %s115_s3, 512, %s117_s11, [#allocation10], %s279_s20, %s279_s20, %s280_s21  }
  0x1a   :  { %272 = dma.done.wait [#allocation4], 512  }
  0x1b   :  { %273 = vsyncadd [#allocation4], 4294966784 }
  0x1c   :  { %274 = dma.done.wait [#allocation7], 1024  }
  0x1d   :  { %275 = vsyncadd [#allocation7], 4294966272 }
  0x1e   :  { %276 = dma.done.wait [#allocation10], 512  }
  0x1f   :  { %277 = vsyncadd [#allocation10], 4294966784 }
  0x20   :  { %139 = vsyncpa [#allocation3], 1 }
  0x21   :  { %140 = vsyncpa [#allocation4], 1 }
  0x22   :  { %141 = vsyncpa [#allocation7], 1 }
  0x23   :  { %142 = vsyncpa [#allocation10], 1 }

</bundles_post_ra>
